<compile_context>
chip_gen: v5e
topology: v5e:2x2
jax: 0.10.0
libtpu: 0.0.40
codegen_flags: <defaults>
</compile_context>

<pallas_src>
import jax
import jax.numpy as jnp
from jax.experimental import pallas as pl
from jax.experimental.pallas import tpu as pltpu


# ----------------------------------------------------------------------------
# Kernel 1: shared point-wise MLP  k -> 64 -> 128 -> 1024 (ReLU)  + online max
# One (batch, point-tile) per grid step; running max lives in the resident
# output block [1, 1, 1024].
# ----------------------------------------------------------------------------
def _pointwise_mlp_maxpool_kernel(x_ref,
                                  w1_ref, b1_ref, w2_ref, b2_ref, w3_ref, b3_ref,
                                  o_ref):
    n = pl.program_id(1)

    @pl.when(n == 0)
    def _():
        o_ref[...] = jnp.full_like(o_ref, -jnp.inf)

    x = x_ref[0]                                                    # [TN, k] bf16

    h = jnp.dot(x, w1_ref[...], preferred_element_type=jnp.float32) + b1_ref[...]
    h = jnp.maximum(h, 0.0).astype(jnp.bfloat16)                    # [TN, 64]
    h = jnp.dot(h, w2_ref[...], preferred_element_type=jnp.float32) + b2_ref[...]
    h = jnp.maximum(h, 0.0).astype(jnp.bfloat16)                    # [TN, 128]
    h = jnp.dot(h, w3_ref[...], preferred_element_type=jnp.float32) + b3_ref[...]
    h = jnp.maximum(h, 0.0)                                         # [TN, 1024] f32

    # online max over the points of this tile (sublane reduction -> lane-dense)
    o_ref[0] = jnp.maximum(o_ref[0], jnp.max(h, axis=0, keepdims=True))


# ----------------------------------------------------------------------------
# Kernel 2: FC head 1024 -> 512 -> 256 -> k*k, batched over all B at once.
# Identity offset is pre-folded into the last bias.
# ----------------------------------------------------------------------------
def _fc_head_kernel(g_ref, wf1_ref, bf1_ref, wf2_ref, bf2_ref, wf3_ref, bf3_ref,
                    o_ref):
    g = g_ref[...].astype(jnp.bfloat16)                             # [B, 1024]
    f = jnp.dot(g, wf1_ref[...], preferred_element_type=jnp.float32) + bf1_ref[...]
    f = jnp.maximum(f, 0.0).astype(jnp.bfloat16)                    # [B, 512]
    f = jnp.dot(f, wf2_ref[...], preferred_element_type=jnp.float32) + bf2_ref[...]
    f = jnp.maximum(f, 0.0).astype(jnp.bfloat16)                    # [B, 256]
    o_ref[...] = (jnp.dot(f, wf3_ref[...], preferred_element_type=jnp.float32)
                  + bf3_ref[...])                                   # [B, k*k]


def stnkd_forward(x, folded, k):
    """x: [B, k, N] float32  ->  [B, k, k] float32."""
    B, _, N = x.shape
    kk = k * k
    (w1, b1, w2, b2, w3, b3, wf1, bf1, wf2, bf2, wf3, bf3) = folded

    # --- choose the point-tile size (multiple of 8, <= 256) and pad N ----------
    if N >= 256:
        TN = 256
    else:
        TN = ((N + 7) // 8) * 8
    n_pad = ((N + TN - 1) // TN) * TN
    n_tiles = n_pad // TN

    xt = jnp.transpose(x, (0, 2, 1))                    # [B, N, k]
    if n_pad != N:
        # edge-replicate padding: duplicated points never change the max-pool
        xt = jnp.pad(xt, ((0, 0), (0, n_pad - N), (0, 0)), mode="edge")
    xt = xt.astype(jnp.bfloat16)                        # bf16 activations

    full = lambda arr: pl.BlockSpec(arr.shape, lambda b, n: (0,) * arr.ndim)

    flops = 2 * B * n_pad * (k * 64 + 64 * 128 + 128 * 1024)
    bytes_accessed = (xt.size * 2
                      + sum(int(w.size) * 2 for w in (w1, w2, w3))
                      + sum(int(bb.size) * 4 for bb in (b1, b2, b3))
                      + B * 1024 * 4)

    pooled = pl.pallas_call(
        _pointwise_mlp_maxpool_kernel,
        out_shape=jax.ShapeDtypeStruct((B, 1, 1024), jnp.float32),
        grid_spec=pltpu.PrefetchScalarGridSpec(
            num_scalar_prefetch=0,
            grid=(B, n_tiles),
            in_specs=[
                pl.BlockSpec((1, TN, k), lambda b, n: (b, n, 0)),   # x tile
                full(w1), full(b1), full(w2), full(b2), full(w3), full(b3),
            ],
            out_specs=pl.BlockSpec((1, 1, 1024), lambda b, n: (b, 0, 0)),
        ),
        compiler_params=pltpu.CompilerParams(
            dimension_semantics=("parallel", "arbitrary"),
            vmem_limit_bytes=32 * 1024 * 1024),
        cost_estimate=pl.CostEstimate(flops=int(flops), transcendentals=0,
                                      bytes_accessed=int(bytes_accessed)),
    )(xt, w1, b1, w2, b2, w3, b3)

    pooled = pooled.reshape(B, 1024)

    out = pl.pallas_call(
        _fc_head_kernel,
        out_shape=jax.ShapeDtypeStruct((B, kk), jnp.float32),
    )(pooled, wf1, bf1, wf2, bf2, wf3, bf3)

    return out.reshape(B, k, k)


# ----------------------------------------------------------------------------
# Deterministic parameter construction + BN folding (plain-JAX glue)
# ----------------------------------------------------------------------------
_EPS = 1e-5


def _init_linear(key, cin, cout):
    kw, kb = jax.random.split(key)
    w = jax.random.normal(kw, (cout, cin), jnp.float32) / jnp.sqrt(cin)
    b = 0.1 * jax.random.normal(kb, (cout,), jnp.float32)
    return w, b


def _init_bn(key, c):
    k1, k2, k3, k4 = jax.random.split(key, 4)
    gamma = 1.0 + 0.1 * jax.random.normal(k1, (c,), jnp.float32)
    beta = 0.1 * jax.random.normal(k2, (c,), jnp.float32)
    mean = 0.1 * jax.random.normal(k3, (c,), jnp.float32)
    var = jax.random.uniform(k4, (c,), jnp.float32, minval=0.5, maxval=1.5)
    return gamma, beta, mean, var


def _fold(w, b, bn):
    """Fold y = BN(x @ w.T + b) into y = x @ wf + bf (inference mode)."""
    gamma, beta, mean, var = bn
    s = gamma / jnp.sqrt(var + _EPS)
    wf = w.T * s[None, :]                       # [cin, cout]
    bf = (b * s + beta - mean * s)[None, :]     # [1, cout]
    return wf, bf


def make_params(key, k):
    ks = jax.random.split(key, 12)
    # conv stack (Conv1d kernel_size=1 ≡ Linear over channels)
    w1, b1 = _init_linear(ks[0], k, 64);      bn1 = _init_bn(ks[1], 64)
    w2, b2 = _init_linear(ks[2], 64, 128);    bn2 = _init_bn(ks[3], 128)
    w3, b3 = _init_linear(ks[4], 128, 1024);  bn3 = _init_bn(ks[5], 1024)
    # fc stack
    wf1, bf1 = _init_linear(ks[6], 1024, 512);  bnf1 = _init_bn(ks[7], 512)
    wf2, bf2 = _init_linear(ks[8], 512, 256);   bnf2 = _init_bn(ks[9], 256)
    wf3, bf3 = _init_linear(ks[10], 256, k * k)

    w1f, b1f = _fold(w1, b1, bn1)
    w2f, b2f = _fold(w2, b2, bn2)
    w3f, b3f = _fold(w3, b3, bn3)
    wf1f, bf1f = _fold(wf1, bf1, bnf1)
    wf2f, bf2f = _fold(wf2, bf2, bnf2)
    # last linear: no BN; fold the flattened identity that forward() adds
    wf3f = wf3.T
    bf3f = (bf3 + jnp.eye(k, dtype=jnp.float32).reshape(-1))[None, :]

    bf16 = lambda w: w.astype(jnp.bfloat16)   # MXU-native operand dtype
    return (bf16(w1f), b1f, bf16(w2f), b2f, bf16(w3f), b3f,
            bf16(wf1f), bf1f, bf16(wf2f), bf2f, bf16(wf3f), bf3f)


# ----------------------------------------------------------------------------
# Pure-JAX reference (same folded bf16 weights, f32 accumulation)
# ----------------------------------------------------------------------------
def stnkd_reference(x, folded, k):
    (w1, b1, w2, b2, w3, b3, wf1, bf1, wf2, bf2, wf3, bf3) = folded
    xt = jnp.transpose(x, (0, 2, 1)).astype(jnp.bfloat16)          # [B, N, k]
    h = jnp.maximum(jnp.dot(xt, w1, preferred_element_type=jnp.float32) + b1, 0.0)
    h = jnp.maximum(jnp.dot(h.astype(jnp.bfloat16), w2,
                            preferred_element_type=jnp.float32) + b2, 0.0)
    h = jnp.maximum(jnp.dot(h.astype(jnp.bfloat16), w3,
                            preferred_element_type=jnp.float32) + b3, 0.0)
    g = jnp.max(h, axis=1)                                         # [B, 1024]
    f = jnp.maximum(jnp.dot(g.astype(jnp.bfloat16), wf1,
                            preferred_element_type=jnp.float32) + bf1, 0.0)
    f = jnp.maximum(jnp.dot(f.astype(jnp.bfloat16), wf2,
                            preferred_element_type=jnp.float32) + bf2, 0.0)
    out = jnp.dot(f.astype(jnp.bfloat16), wf3,
                  preferred_element_type=jnp.float32) + bf3        # [B, k*k]
    return out.reshape(-1, k, k)


if __name__ == "__main__":
    B, k, N = 2, 4, 16

    key = jax.random.PRNGKey(0)
    kx, kp = jax.random.split(key)
    x = jax.random.normal(kx, (B, k, N), jnp.float32)
    folded = make_params(kp, k)

    out = stnkd_forward(x, folded, k)
    out = jax.block_until_ready(out)

    ref = stnkd_reference(x, folded, k)
    assert out.shape == (B, k, k), out.shape
    err = jnp.max(jnp.abs(out - ref))
    # bf16 operands + f32 accumulation: tolerance covers accumulation-order /
    # bf16-ulp differences between the kernel and the XLA reference.
    assert jnp.allclose(out, ref, rtol=2e-2, atol=2e-2), f"max abs err = {err}"

    print("KERNEL_OK")
</pallas_src>

<mosaic_0001>
module attributes {stable_mosaic.version = 11 : i64} {
  func.func @_pointwise_mlp_maxpool_kernel(%arg0: i32, %arg1: i32, %arg2: memref<1x16x4xbf16, #tpu.memory_space<vmem>>, %arg3: memref<4x64xbf16, #tpu.memory_space<vmem>>, %arg4: memref<1x64xf32, #tpu.memory_space<vmem>>, %arg5: memref<64x128xbf16, #tpu.memory_space<vmem>>, %arg6: memref<1x128xf32, #tpu.memory_space<vmem>>, %arg7: memref<128x1024xbf16, #tpu.memory_space<vmem>>, %arg8: memref<1x1024xf32, #tpu.memory_space<vmem>>, %arg9: memref<1x1x1024xf32, #tpu.memory_space<vmem>>) attributes {dimension_semantics = [#tpu.dimension_semantics<parallel>, #tpu.dimension_semantics<arbitrary>], iteration_bounds = array<i64: 2, 1>, scalar_prefetch = 0 : i64, scratch_operands = 0 : i64, tpu.core_type = #tpu.core_type<tc>, window_params = [{transform_indices = @transform_0, window_bounds = array<i64: 1, 16, 4>}, {pipeline_mode = #tpu.pipeline_mode<synchronous>, transform_indices = @transform_1, window_bounds = array<i64: 4, 64>}, {pipeline_mode = #tpu.pipeline_mode<synchronous>, transform_indices = @transform_2, window_bounds = array<i64: 1, 64>}, {pipeline_mode = #tpu.pipeline_mode<synchronous>, transform_indices = @transform_3, window_bounds = array<i64: 64, 128>}, {pipeline_mode = #tpu.pipeline_mode<synchronous>, transform_indices = @transform_4, window_bounds = array<i64: 1, 128>}, {pipeline_mode = #tpu.pipeline_mode<synchronous>, transform_indices = @transform_5, window_bounds = array<i64: 128, 1024>}, {pipeline_mode = #tpu.pipeline_mode<synchronous>, transform_indices = @transform_6, window_bounds = array<i64: 1, 1024>}, {transform_indices = @transform_7, window_bounds = array<i64: 1, 1, 1024>}]} {
    %c0_i32 = arith.constant 0 : i32
    %0 = arith.cmpi eq, %arg1, %c0_i32 : i32
    %1 = arith.extui %0 : i1 to i32
    %c0_i32_0 = arith.constant 0 : i32
    %2 = arith.cmpi ne, %1, %c0_i32_0 : i32
    scf.if %2 {
      %cst_27 = arith.constant 0xFF800000 : f32
      %36 = vector.broadcast %cst_27 : f32 to vector<1x1x1024xf32>
      %c0_28 = arith.constant 0 : index
      %c0_29 = arith.constant 0 : index
      %c0_30 = arith.constant 0 : index
      %37 = vector.load %arg9[%c0_28, %c0_29, %c0_30] : memref<1x1x1024xf32, #tpu.memory_space<vmem>>, vector<1x1x1024xf32>
      tpu.vector_store %arg9[%c0_28, %c0_29, %c0_30], %36 {strides = array<i32>} : memref<1x1x1024xf32, #tpu.memory_space<vmem>>, vector<1x1x1024xf32>,
    } else {
    }
    %c0 = arith.constant 0 : index
    %c0_1 = arith.constant 0 : index
    %c0_2 = arith.constant 0 : index
    %3 = vector.load %arg2[%c0, %c0_1, %c0_2] : memref<1x16x4xbf16, #tpu.memory_space<vmem>>, vector<1x16x4xbf16>
    %4 = vector.shape_cast %3 : vector<1x16x4xbf16> to vector<16x4xbf16>
    %c0_3 = arith.constant 0 : index
    %c0_4 = arith.constant 0 : index
    %5 = vector.load %arg3[%c0_3, %c0_4] : memref<4x64xbf16, #tpu.memory_space<vmem>>, vector<4x64xbf16>
    %cst = arith.constant dense<0.000000e+00> : vector<16x64xf32>
    %6 = tpu.matmul %4, %5, %cst {dimension_numbers = #tpu.dot_dimension_numbers<[1], [0], [0], [1], [0, 0, 1, 1], [], []>} : vector<16x4xbf16>, vector<4x64xbf16>, vector<16x64xf32> -> vector<16x64xf32>
    %c0_5 = arith.constant 0 : index
    %c0_6 = arith.constant 0 : index
    %7 = vector.load %arg4[%c0_5, %c0_6] : memref<1x64xf32, #tpu.memory_space<vmem>>, vector<1x64xf32>
    %8 = vector.broadcast %7 : vector<1x64xf32> to vector<16x64xf32>
    %9 = arith.addf %6, %8 : vector<16x64xf32>
    %cst_7 = arith.constant 0.000000e+00 : f32
    %10 = vector.broadcast %cst_7 : f32 to vector<16x64xf32>
    %11 = arith.maximumf %9, %10 : vector<16x64xf32>
    %12 = arith.truncf %11 : vector<16x64xf32> to vector<16x64xbf16>
    %c0_8 = arith.constant 0 : index
    %c0_9 = arith.constant 0 : index
    %13 = vector.load %arg5[%c0_8, %c0_9] : memref<64x128xbf16, #tpu.memory_space<vmem>>, vector<64x128xbf16>
    %cst_10 = arith.constant dense<0.000000e+00> : vector<16x128xf32>
    %14 = tpu.matmul %12, %13, %cst_10 {dimension_numbers = #tpu.dot_dimension_numbers<[1], [0], [0], [1], [0, 0, 1, 1], [], []>} : vector<16x64xbf16>, vector<64x128xbf16>, vector<16x128xf32> -> vector<16x128xf32>
    %c0_11 = arith.constant 0 : index
    %c0_12 = arith.constant 0 : index
    %15 = vector.load %arg6[%c0_11, %c0_12] : memref<1x128xf32, #tpu.memory_space<vmem>>, vector<1x128xf32>
    %16 = vector.broadcast %15 : vector<1x128xf32> to vector<16x128xf32>
    %17 = arith.addf %14, %16 : vector<16x128xf32>
    %cst_13 = arith.constant 0.000000e+00 : f32
    %18 = vector.broadcast %cst_13 : f32 to vector<16x128xf32>
    %19 = arith.maximumf %17, %18 : vector<16x128xf32>
    %20 = arith.truncf %19 : vector<16x128xf32> to vector<16x128xbf16>
    %c0_14 = arith.constant 0 : index
    %c0_15 = arith.constant 0 : index
    %21 = vector.load %arg7[%c0_14, %c0_15] : memref<128x1024xbf16, #tpu.memory_space<vmem>>, vector<128x1024xbf16>
    %cst_16 = arith.constant dense<0.000000e+00> : vector<16x1024xf32>
    %22 = tpu.matmul %20, %21, %cst_16 {dimension_numbers = #tpu.dot_dimension_numbers<[1], [0], [0], [1], [0, 0, 1, 1], [], []>} : vector<16x128xbf16>, vector<128x1024xbf16>, vector<16x1024xf32> -> vector<16x1024xf32>
    %c0_17 = arith.constant 0 : index
    %c0_18 = arith.constant 0 : index
    %23 = vector.load %arg8[%c0_17, %c0_18] : memref<1x1024xf32, #tpu.memory_space<vmem>>, vector<1x1024xf32>
    %24 = vector.broadcast %23 : vector<1x1024xf32> to vector<16x1024xf32>
    %25 = arith.addf %22, %24 : vector<16x1024xf32>
    %cst_19 = arith.constant 0.000000e+00 : f32
    %26 = vector.broadcast %cst_19 : f32 to vector<16x1024xf32>
    %27 = arith.maximumf %25, %26 : vector<16x1024xf32>
    %c0_20 = arith.constant 0 : index
    %c0_21 = arith.constant 0 : index
    %c0_22 = arith.constant 0 : index
    %28 = vector.load %arg9[%c0_20, %c0_21, %c0_22] : memref<1x1x1024xf32, #tpu.memory_space<vmem>>, vector<1x1x1024xf32>
    %29 = vector.shape_cast %28 : vector<1x1x1024xf32> to vector<1x1024xf32>
    %cst_23 = arith.constant dense<0xFF800000> : vector<1024xf32>
    %30 = vector.multi_reduction <maximumf>, %27, %cst_23 [0] : vector<16x1024xf32> to vector<1024xf32>
    %31 = vector.shape_cast %30 : vector<1024xf32> to vector<1x1024xf32>
    %32 = arith.maximumf %29, %31 : vector<1x1024xf32>
    %c0_24 = arith.constant 0 : index
    %c0_25 = arith.constant 0 : index
    %c0_26 = arith.constant 0 : index
    %33 = vector.load %arg9[%c0_24, %c0_25, %c0_26] : memref<1x1x1024xf32, #tpu.memory_space<vmem>>, vector<1x1x1024xf32>
    %34 = vector.shape_cast %33 : vector<1x1x1024xf32> to vector<1x1024xf32>
    %35 = vector.shape_cast %32 : vector<1x1024xf32> to vector<1x1x1024xf32>
    tpu.vector_store %arg9[%c0_24, %c0_25, %c0_26], %35 {strides = array<i32>} : memref<1x1x1024xf32, #tpu.memory_space<vmem>>, vector<1x1x1024xf32>,
    return
  }
  func.func @transform_0(%arg0: i32, %arg1: i32) -> (i32, i32, i32) {
    %c0_i32 = arith.constant 0 : i32
    %c0_i32_0 = arith.constant 0 : i32
    return %arg0, %arg1, %c0_i32 : i32, i32, i32
  }
  func.func @transform_1(%arg0: i32, %arg1: i32) -> (i32, i32) {
    %c0_i32 = arith.constant 0 : i32
    %c0_i32_0 = arith.constant 0 : i32
    %c0_i32_1 = arith.constant 0 : i32
    return %c0_i32, %c0_i32_0 : i32, i32
  }
  func.func @transform_2(%arg0: i32, %arg1: i32) -> (i32, i32) {
    %c0_i32 = arith.constant 0 : i32
    %c0_i32_0 = arith.constant 0 : i32
    %c0_i32_1 = arith.constant 0 : i32
    return %c0_i32, %c0_i32_0 : i32, i32
  }
  func.func @transform_3(%arg0: i32, %arg1: i32) -> (i32, i32) {
    %c0_i32 = arith.constant 0 : i32
    %c0_i32_0 = arith.constant 0 : i32
    %c0_i32_1 = arith.constant 0 : i32
    return %c0_i32, %c0_i32_0 : i32, i32
  }
  func.func @transform_4(%arg0: i32, %arg1: i32) -> (i32, i32) {
    %c0_i32 = arith.constant 0 : i32
    %c0_i32_0 = arith.constant 0 : i32
    %c0_i32_1 = arith.constant 0 : i32
    return %c0_i32, %c0_i32_0 : i32, i32
  }
  func.func @transform_5(%arg0: i32, %arg1: i32) -> (i32, i32) {
    %c0_i32 = arith.constant 0 : i32
    %c0_i32_0 = arith.constant 0 : i32
    %c0_i32_1 = arith.constant 0 : i32
    return %c0_i32, %c0_i32_0 : i32, i32
  }
  func.func @transform_6(%arg0: i32, %arg1: i32) -> (i32, i32) {
    %c0_i32 = arith.constant 0 : i32
    %c0_i32_0 = arith.constant 0 : i32
    %c0_i32_1 = arith.constant 0 : i32
    return %c0_i32, %c0_i32_0 : i32, i32
  }
  func.func @transform_7(%arg0: i32, %arg1: i32) -> (i32, i32, i32) {
    %c0_i32 = arith.constant 0 : i32
    %c0_i32_0 = arith.constant 0 : i32
    %c0_i32_1 = arith.constant 0 : i32
    return %arg0, %c0_i32, %c0_i32_0 : i32, i32, i32
  }
}

</mosaic_0001>

<bundles_post_ra>
// kernel: tpu_custom_call.1
= control target key start
LH: loop header
LB: loop body
LE: loop exit
PB: predicated region body
PF: predicated region fallthrough
CT: control target
= control target key end

     0   :  { %s1965_s0 = inlined_call_operand.vmem [shape: bf16[2,16,4], index: 0, kind: input, shape index: {}]   ;;  %s1966_s1 = inlined_call_operand.vmem [shape: bf16[4,64], index: 1, kind: input, shape index: {}]   ;;  %s1967_s2 = inlined_call_operand.vmem [shape: f32[1,64], index: 2, kind: input, shape index: {}]   ;;  %s1968_s3 = inlined_call_operand.hbm [shape: bf16[64,128], index: 3, kind: input, shape index: {}]   ;;  %s1969_s4 = inlined_call_operand.vmem [shape: f32[1,128], index: 4, kind: input, shape index: {}]   ;;  %s1970_s5 = inlined_call_operand.hbm [shape: bf16[128,1024], index: 5, kind: input, shape index: {}]   ;;  %s1971_s6 = inlined_call_operand.vmem [shape: f32[1,1024], index: 6, kind: input, shape index: {}]   ;;  %s1972_s7 = inlined_call_operand.hbm [shape: f32[2,1,1024], index: 7, kind: output, shape index: {}]  }
   0x1   :  { %1973 = sst [smem:[#allocation11_spill]] %s1968_s3 }
   0x2   :  { %12 = vsyncpa [#allocation3], 0 }
   0x3   :  { %13 = vsyncpa [#allocation6], 0 }
   0x4   :  { %14 = vsyncpa [#allocation4], 0 }
   0x5   :  { %16 = vsyncpa [#allocation4 + $0x1], 0  ;;  %s1809_s24 = smov 0   ;;  %s1811_s25 = smov 0  }
   0x6   :  { %s1813_s26 = smov 0   ;;  %s1815_s27 = smov 0  }
   0x7   :  { %s1817_s28 = smov 0   ;;  %s1819_s29 = smov 0  }
   0x8 LB: > { %s1168_s30 = sadd.s32 4294967295, %s1761_s29   ;;  %s1169_s8 = sadd.s32 4294967294, %s1761_s29   ;;  %s1761_s29 = sphi %s1819_s29, %s22_s29   ;;  %s1757_s28 = sphi %s1817_s28, %s1983_s28   ;;  %s1753_s27 = sphi %s1815_s27, %s1982_s27   ;;  %s1749_s26 = sphi %s1813_s26, %s1981_s26   ;;  %s1745_s25 = sphi %s1811_s25, %s1980_s25   ;;  %s1741_s24 = sphi %s1809_s24, %s1979_s24  }
   0x9   : > { %s34_s9 = sadd.s32 1, %s1757_s28  ;;  %s195_s10 = sadd.s32 1, %s1749_s26 }
   0xa   : > { %p36_p0 = scmp.ge.s32.totalorder %s34_s9, 2  ;;  %p205_p1 = scmp.ne.s32.totalorder %s1749_s26, %s1745_s25 }
   0xb   : > { %p206_p2 = scmp.eq.s32.totalorder %s1168_s30, 1  ;;  %p211_p3 = scmp.ne.s32.totalorder %s1745_s25, %s1741_s24 }
   0xc   : > { %s1985_s9 = smov (%p36_p0, %s34_s9), 0  ;;  %p212_p5 = scmp.eq.s32.totalorder %s1169_s8, 1 }
   0xd   : > { %p1849_p4 = por %p206_p2, %p205_p1  ;;  %s192_s12 = ssub.s32 %s1757_s28, %s1985_s9 }
   0xe   : > { %p1170_p6 = scmp.ge.s32.totalorder %s1761_s29, 1  ;;  %p193_p7 = scmp.eq.s32.totalorder %s192_s12, 0 }
   0xf   : > { %p1856_p8 = por %p212_p5, %p211_p3  ;;  %p219_p9 = scmp.lt.s32.totalorder %s1761_s29, 3 }
  0x10   : > { %s1862_s14 = scalar_select %p193_p7, %s1749_s26, %s195_s10  }
  0x11   : > { %p1864_p10 = pnand %p1170_p6, %p219_p9  ;;  %p1868_p11 = scmp.eq.s32.totalorder %s1168_s30, 0 }
  0x12   : > { %s1978_s3 = sld [smem:[#allocation11_spill]]  ;;  %s1763_s20 = smov [#allocation2]  }
  0x13   : > { %p1542_p12 = pneg %p1864_p10  ;;  %s238_s21 = sshll.u32 %s1763_s20, 4  ;;  %s239_s21 = int_to_ptr.vmem [resolvable:$true] %s238_s21 }
  0x14   : > { %s253_s30 = sshll.u32 %s1970_s5, 4  ;;  %s1764_s8 = smov 64   ;;  %s254_s30 = int_to_ptr.hbm [resolvable:$true] %s253_s30 }
  0x15   : > { %p1543_p13 = pnand %p1868_p11, %p1542_p12  ;;  %s1765_s10 = smov 4  }
  0x16   : > { %s1766_s12 = smov [#allocation5]   ;;  %s1767_s18 = smov 512  }
  0x17   : > { %s255_s17 = sshll.u32 %s1766_s12, 4  ;;  %287 = sbr.rel (%p1864_p10) target bundleno = 500 (0x1f4), region = 48  ;;  %s256_s17 = int_to_ptr.vmem [resolvable:$true] %s255_s17 }
  0x18   : > { %s236_s19 = sshll.u32 %s1978_s3, 4  ;;  %s1768_s3 = smov 32   ;;  %s237_s19 = int_to_ptr.hbm [resolvable:$true] %s236_s19 }
  0x19   : > { %1545 = dma.hbm_to_vmem [thread:$0]  (!%p1543_p13), %s237_s19, 512, %s239_s21, [#allocation3], %s1764_s8, %s1764_s8, %s1765_s10  }
  0x1a   : > { %1548 = dma.hbm_to_vmem [thread:$0]  (!%p1543_p13), %s254_s30, 8192, %s256_s17, [#allocation6], %s1767_s18, %s1767_s18, %s1768_s3  }
  0x1c   : > { %1728 = dma.done.wait (%p1868_p11), [#allocation3], 512  }
  0x1d   : > { %1730 = vsyncadd (%p1868_p11), [#allocation3], 4294966784 }
  0x1e   : > { %1732 = dma.done.wait (%p1868_p11), [#allocation6], 8192  }
  0x1f   : > { %1734 = vsyncadd (%p1868_p11), [#allocation6], 4294959104  ;;  %p330_p0 = scmp.lt.s32.totalorder %s1753_s27, 1  ;;  %vm361_vm0 = vcmask 1041408   ;;  %v347_v0 = vld [vmem:[%s1966_s1] sm:$0x3] }
  0x20   : > { %v363_v1 = vsel %vm361_vm0, %v347_v0, 0  ;;  %vm357_vm1 = vcmask 31744   ;;  %v1467_v3 = vld [vmem:[#allocation2 + $0x18] sm:$0xff]  ;;  %v1466_v4 = vld [vmem:[#allocation2 + $0x10] sm:$0xff]  ;;  %v1465_v5 = vld [vmem:[#allocation2 + $0x8] sm:$0xff]  ;;  %vm418_vm2 = vcmask 523264  }
  0x21   : > { %s331_s19 = scalar_select %p330_p0, %s1753_s27, 1  ;;  %372 = vmatpush.bf16.msra.mxu0 %v363_v1  ;;  %426 = vmatpush.bf16.msra.mxu1 %v1467_v3  ;;  %v1464_v6 = vld [vmem:[#allocation2] sm:$0xff]  ;;  %v1436_v12 = vld [vmem:[#allocation5 + $0x1c8] sm:$0xf]  ;;  %v1525_v16 = vld [vmem:[#allocation5 + $0x1cc] sm:$0xf] }
  0x22   : > { %v1428_v7 = vld [vmem:[#allocation5 + $0x1c0] sm:$0xf]  ;;  %v1524_v9 = vld [vmem:[#allocation5 + $0x1c4] sm:$0xf]  ;;  %v1529_v13 = vld [vmem:[#allocation5 + $0x1e4] sm:$0xf0] }
  0x23   : > { %s1462_s3 = sshll.u32 %s331_s19, 3  ;;  %v1528_v8 = vld [vmem:[#allocation5 + $0x1dc] sm:$0xf0]  ;;  %v1430_v11 = vld [vmem:[#allocation5 + $0x1e0] sm:$0xf0]  ;;  %v1437_v15 = vor.u32 %v1529_v13, %v1436_v12  ;;  %s326_s18 = sand.u32 1, %s1745_s25  }
  0x24   : > { %s337_s21 = scalar_lea.vmem %s1965_s0, %s1462_s3  ;;  %v1429_v10 = vor.u32 %v1528_v8, %v1428_v7  ;;  %v1433_v14 = vor.u32 %v1524_v9, %v1430_v11  ;;  %v1438_v17 = vld [vmem:[#allocation5 + $0x1e8] sm:$0xf0]  ;;  %v1396_v18 = vld [vmem:[#allocation5 + $0x180] sm:$0xf]  ;;  %v1516_v21 = vld [vmem:[#allocation5 + $0x184] sm:$0xf] }
  0x25   : > { %v1463_v2 = vld [vmem:[%s337_s21] sm:$0xff]  ;;  %427 = vmatpush.bf16.msra.mxu1 %v1466_v4  ;;  %v1441_v19 = vor.u32 %v1525_v16, %v1438_v17  ;;  %869 = vmatpush.bf16.msrb.mxu0 %v1437_v15  ;;  %v1404_v25 = vld [vmem:[#allocation5 + $0x188] sm:$0xf]  ;;  %v1517_v27 = vld [vmem:[#allocation5 + $0x18c] sm:$0xf]  ;;  %s1923_s19 = sshll.u32 %s326_s18, 3 }
  0x26   : > { %1184 = vmatmul.msk.bf16.vlgmr.msra.gmra.mxu0 %vm357_vm1, %v1463_v2  ;;  %841 = vmatpush.bf16.msra.mxu2 %v1429_v10  ;;  %v1520_v20 = vld [vmem:[#allocation5 + $0x19c] sm:$0xf0]  ;;  %v1398_v22 = vld [vmem:[#allocation5 + $0x1a0] sm:$0xf0]  ;;  %v1521_v26 = vld [vmem:[#allocation5 + $0x1a4] sm:$0xf0] }
  0x27   : > { %855 = vmatpush.bf16.msra.mxu3 %v1433_v14  ;;  %v1397_v23 = vor.u32 %v1520_v20, %v1396_v18  ;;  %v1401_v24 = vor.u32 %v1516_v21, %v1398_v22  ;;  %v1405_v28 = vor.u32 %v1521_v26, %v1404_v25  ;;  %v1406_v29 = vld [vmem:[#allocation5 + $0x1a8] sm:$0xf0]  ;;  %v1364_v30 = vld [vmem:[#allocation5 + $0x140] sm:$0xf]  ;;  %v1508_v33 = vld [vmem:[#allocation5 + $0x144] sm:$0xf] }
  0x28   : > { %v1512_v31 = vld [vmem:[#allocation5 + $0x15c] sm:$0xf0]  ;;  %v1409_v32 = vor.u32 %v1517_v27, %v1406_v29  ;;  %v1366_v34 = vld [vmem:[#allocation5 + $0x160] sm:$0xf0]  ;;  %v1372_v35 = vld [vmem:[#allocation5 + $0x148] sm:$0xf] }
  0x29   : > { %428 = vmatpush.bf16.msra.mxu1 %v1465_v5  ;;  %v1365_v36 = vor.u32 %v1512_v31, %v1364_v30  ;;  %v1513_v37 = vld [vmem:[#allocation5 + $0x164] sm:$0xf0]  ;;  %v1509_v38 = vld [vmem:[#allocation5 + $0x14c] sm:$0xf]  ;;  %870 = vmatpush.bf16.msrb.mxu0 %v1405_v28  ;;  %v1369_v40 = vor.u32 %v1508_v33, %v1366_v34  ;;  %v1332_v42 = vld [vmem:[#allocation5 + $0x100] sm:$0xf] }
  0x2a   : > { %842 = vmatpush.bf16.msra.mxu2 %v1397_v23  ;;  %v1374_v39 = vld [vmem:[#allocation5 + $0x168] sm:$0xf0]  ;;  %v1373_v41 = vor.u32 %v1513_v37, %v1372_v35  ;;  %v1504_v43 = vld [vmem:[#allocation5 + $0x11c] sm:$0xf0]  ;;  %v1500_v44 = vld [vmem:[#allocation5 + $0x104] sm:$0xf] }
  0x2b   : > { %856 = vmatpush.bf16.msra.mxu3 %v1401_v24  ;;  %v1377_v45 = vor.u32 %v1509_v38, %v1374_v39  ;;  %v1334_v46 = vld [vmem:[#allocation5 + $0x120] sm:$0xf0]  ;;  %v1340_v47 = vld [vmem:[#allocation5 + $0x108] sm:$0xf]  ;;  %v1501_v49 = vld [vmem:[#allocation5 + $0x10c] sm:$0xf]  ;;  %v1333_v51 = vor.u32 %v1504_v43, %v1332_v42 }
  0x2c   : > { %v1505_v48 = vld [vmem:[#allocation5 + $0x124] sm:$0xf0]  ;;  %v1342_v50 = vld [vmem:[#allocation5 + $0x128] sm:$0xf0]  ;;  %v1337_v52 = vor.u32 %v1500_v44, %v1334_v46  ;;  %v1300_v54 = vld [vmem:[#allocation5 + $0xc0] sm:$0xf] }
  0x2d   : > { %429 = vmatpush.bf16.msra.mxu1 %v1464_v6  ;;  %871 = vmatpush.bf16.msrb.mxu0 %v1373_v41  ;;  %v1341_v53 = vor.u32 %v1505_v48, %v1340_v47  ;;  %v1496_v55 = vld [vmem:[#allocation5 + $0xdc] sm:$0xf0]  ;;  %v1492_v56 = vld [vmem:[#allocation5 + $0xc4] sm:$0xf]  ;;  %v1345_v57 = vor.u32 %v1501_v49, %v1342_v50  ;;  %v1308_v59 = vld [vmem:[#allocation5 + $0xc8] sm:$0xf] }
  0x2e   : > { %843 = vmatpush.bf16.msra.mxu2 %v1365_v36  ;;  %v1302_v58 = vld [vmem:[#allocation5 + $0xe0] sm:$0xf0]  ;;  %v1497_v60 = vld [vmem:[#allocation5 + $0xe4] sm:$0xf0]  ;;  %v1493_v61 = vld [vmem:[#allocation5 + $0xcc] sm:$0xf]  ;;  %v1301_v63 = vor.u32 %v1496_v55, %v1300_v54 }
  0x2f   : > { %857 = vmatpush.bf16.msra.mxu3 %v1369_v40  ;;  %v1310_v62 = vld [vmem:[#allocation5 + $0xe8] sm:$0xf0]  ;;  %v1305_v0 = vor.u32 %v1492_v56, %v1302_v58  ;;  %v1309_v1 = vor.u32 %v1497_v60, %v1308_v59  ;;  %v1268_v2 = vld [vmem:[#allocation5 + $0x80] sm:$0xf]  ;;  %v1484_v4 = vld [vmem:[#allocation5 + $0x84] sm:$0xf] }
  0x30   : > { %v1488_v3 = vld [vmem:[#allocation5 + $0x9c] sm:$0xf0]  ;;  %v1313_v6 = vor.u32 %v1493_v61, %v1310_v62  ;;  %v1270_v7 = vld [vmem:[#allocation5 + $0xa0] sm:$0xf0]  ;;  %v1276_v8 = vld [vmem:[#allocation5 + $0x88] sm:$0xf] }
  0x31   : > { %883 = vmatpush.bf16.msrb.mxu1 %v1441_v19  ;;  %872 = vmatpush.bf16.msrb.mxu0 %v1341_v53  ;;  %v1489_v9 = vld [vmem:[#allocation5 + $0xa4] sm:$0xf0]  ;;  %v1485_v10 = vld [vmem:[#allocation5 + $0x8c] sm:$0xf]  ;;  %v1613_v12 = vld [vmem:[%s1967_s2] ss:$0 sm:$0xff]  ;;  %v1269_v13 = vor.u32 %v1488_v3, %v1268_v2  ;;  %v1273_v14 = vor.u32 %v1484_v4, %v1270_v7 }
  0x32   : > { %844 = vmatpush.bf16.msra.mxu2 %v1333_v51  ;;  %v1278_v11 = vld [vmem:[#allocation5 + $0xa8] sm:$0xf0]  ;;  %v1277_v15 = vor.u32 %v1489_v9, %v1276_v8  ;;  %v1236_v16 = vld [vmem:[#allocation5 + $0x40] sm:$0xf]  ;;  %v1476_v18 = vld [vmem:[#allocation5 + $0x44] sm:$0xf] }
  0x33   : > { %858 = vmatpush.bf16.msra.mxu3 %v1337_v52  ;;  %v1480_v17 = vld [vmem:[#allocation5 + $0x5c] sm:$0xf0]  ;;  %v1281_v19 = vor.u32 %v1485_v10, %v1278_v11  ;;  %v1238_v20 = vld [vmem:[#allocation5 + $0x60] sm:$0xf0]  ;;  %v1244_v21 = vld [vmem:[#allocation5 + $0x48] sm:$0xf] }
  0x34   : > { %v1481_v22 = vld [vmem:[#allocation5 + $0x64] sm:$0xf0]  ;;  %v1477_v23 = vld [vmem:[#allocation5 + $0x4c] sm:$0xf]  ;;  %v1237_v25 = vor.u32 %v1480_v17, %v1236_v16  ;;  %v1241_v27 = vor.u32 %v1476_v18, %v1238_v20  ;;  %v1204_v29 = vld [vmem:[#allocation5] sm:$0xf] }
  0x35   : > { %884 = vmatpush.bf16.msrb.mxu1 %v1409_v32  ;;  %873 = vmatpush.bf16.msrb.mxu0 %v1309_v1  ;;  %v1246_v24 = vld [vmem:[#allocation5 + $0x68] sm:$0xf0]  ;;  %v1245_v28 = vor.u32 %v1481_v22, %v1244_v21  ;;  %v1472_v30 = vld [vmem:[#allocation5 + $0x1c] sm:$0xf0]  ;;  %v1468_v33 = vld [vmem:[#allocation5 + $0x4] sm:$0xf] }
  0x36   : > { %845 = vmatpush.bf16.msra.mxu2 %v1301_v63  ;;  %v1249_v32 = vor.u32 %v1477_v23, %v1246_v24  ;;  %v1206_v34 = vld [vmem:[#allocation5 + $0x20] sm:$0xf0]  ;;  %v1212_v35 = vld [vmem:[#allocation5 + $0x8] sm:$0xf]  ;;  %v1469_v38 = vld [vmem:[#allocation5 + $0xc] sm:$0xf]  ;;  %v1205_v40 = vor.u32 %v1472_v30, %v1204_v29 }
  0x37   : > { %859 = vmatpush.bf16.msra.mxu3 %v1305_v0  ;;  %v1473_v37 = vld [vmem:[#allocation5 + $0x24] sm:$0xf0]  ;;  %v1214_v39 = vld [vmem:[#allocation5 + $0x28] sm:$0xf0]  ;;  %v1209_v43 = vor.u32 %v1468_v33, %v1206_v34  ;;  %v1444_v47 = vld [vmem:[#allocation5 + $0x1d0] sm:$0xf] }
  0x38   : > { %v1213_v44 = vor.u32 %v1473_v37, %v1212_v35  ;;  %v1530_v48 = vld [vmem:[#allocation5 + $0x1ec] sm:$0xf0]  ;;  %v1526_v49 = vld [vmem:[#allocation5 + $0x1d4] sm:$0xf]  ;;  %v1452_v52 = vld [vmem:[#allocation5 + $0x1d8] sm:$0xf] }
  0x39   : > { %885 = vmatpush.bf16.msrb.mxu1 %v1377_v45  ;;  %874 = vmatpush.bf16.msrb.mxu0 %v1277_v15  ;;  %v1217_v45 = vor.u32 %v1469_v38, %v1214_v39  ;;  %v1445_v50 = vor.u32 %v1530_v48, %v1444_v47  ;;  %v1446_v51 = vld [vmem:[#allocation5 + $0x1f0] sm:$0xf0]  ;;  %v1531_v53 = vld [vmem:[#allocation5 + $0x1f4] sm:$0xf0]  ;;  %v1527_v56 = vld [vmem:[#allocation5 + $0x1dc] sm:$0xf] }
  0x3a   : > { %846 = vmatpush.bf16.msra.mxu2 %v1269_v13  ;;  %v1449_v54 = vor.u32 %v1526_v49, %v1446_v51  ;;  %v1453_v55 = vor.u32 %v1531_v53, %v1452_v52  ;;  %v1412_v59 = vld [vmem:[#allocation5 + $0x190] sm:$0xf]  ;;  %v1518_v61 = vld [vmem:[#allocation5 + $0x194] sm:$0xf]  ;;  %v1420_v0 = vld [vmem:[#allocation5 + $0x198] sm:$0xf] }
  0x3b   : > { %860 = vmatpush.bf16.msra.mxu3 %v1273_v14  ;;  %v1522_v60 = vld [vmem:[#allocation5 + $0x1ac] sm:$0xf0]  ;;  %v1414_v63 = vld [vmem:[#allocation5 + $0x1b0] sm:$0xf0]  ;;  %v1523_v1 = vld [vmem:[#allocation5 + $0x1b4] sm:$0xf0] }
  0x3c   : > { %v1413_v62 = vor.u32 %v1522_v60, %v1412_v59  ;;  %v1417_v2 = vor.u32 %v1518_v61, %v1414_v63  ;;  %v1421_v3 = vor.u32 %v1523_v1, %v1420_v0  ;;  %v1519_v4 = vld [vmem:[#allocation5 + $0x19c] sm:$0xf]  ;;  %v1380_v7 = vld [vmem:[#allocation5 + $0x150] sm:$0xf]  ;;  %v1510_v9 = vld [vmem:[#allocation5 + $0x154] sm:$0xf] }
  0x3d   : > { %886 = vmatpush.bf16.msrb.mxu1 %v1345_v57  ;;  %875 = vmatpush.bf16.msrb.mxu0 %v1245_v28  ;;  %v1454_v57 = vld [vmem:[#allocation5 + $0x1f8] sm:$0xf0]  ;;  %v1514_v8 = vld [vmem:[#allocation5 + $0x16c] sm:$0xf0]  ;;  %v1382_v11 = vld [vmem:[#allocation5 + $0x170] sm:$0xf0] }
  0x3e   : > { %847 = vmatpush.bf16.msra.mxu2 %v1237_v25  ;;  %v1457_v58 = vor.u32 %v1527_v56, %v1454_v57  ;;  %v1381_v10 = vor.u32 %v1514_v8, %v1380_v7  ;;  %v1515_v13 = vld [vmem:[#allocation5 + $0x174] sm:$0xf0]  ;;  %v1385_v14 = vor.u32 %v1510_v9, %v1382_v11  ;;  %v1511_v16 = vld [vmem:[#allocation5 + $0x15c] sm:$0xf]  ;;  %v1506_v20 = vld [vmem:[#allocation5 + $0x12c] sm:$0xf0] }
  0x3f   : > { %861 = vmatpush.bf16.msra.mxu3 %v1241_v27  ;;  %v1390_v17 = vld [vmem:[#allocation5 + $0x178] sm:$0xf0]  ;;  %v1502_v21 = vld [vmem:[#allocation5 + $0x114] sm:$0xf]  ;;  %v1356_v24 = vld [vmem:[#allocation5 + $0x118] sm:$0xf] }
  0x40   : > { %v1393_v18 = vor.u32 %v1511_v16, %v1390_v17  ;;  %v1350_v23 = vld [vmem:[#allocation5 + $0x130] sm:$0xf0]  ;;  %v1507_v25 = vld [vmem:[#allocation5 + $0x134] sm:$0xf0]  ;;  %v1503_v28 = vld [vmem:[#allocation5 + $0x11c] sm:$0xf] }
  0x41   : > { %887 = vmatpush.bf16.msrb.mxu1 %v1313_v6  ;;  %876 = vmatpush.bf16.msrb.mxu0 %v1213_v44  ;;  %v1357_v27 = vor.u32 %v1507_v25, %v1356_v24  ;;  %v1358_v29 = vld [vmem:[#allocation5 + $0x138] sm:$0xf0]  ;;  %v1494_v33 = vld [vmem:[#allocation5 + $0xd4] sm:$0xf]  ;;  %v1499_v37 = vld [vmem:[#allocation5 + $0xf4] sm:$0xf0] }
  0x42   : > { %848 = vmatpush.bf16.msra.mxu2 %v1205_v40  ;;  %v1361_v30 = vor.u32 %v1503_v28, %v1358_v29  ;;  %v1318_v35 = vld [vmem:[#allocation5 + $0xf0] sm:$0xf0]  ;;  %v1495_v40 = vld [vmem:[#allocation5 + $0xdc] sm:$0xf]  ;;  %v1490_v44 = vld [vmem:[#allocation5 + $0xac] sm:$0xf0] }
  0x43   : > { %862 = vmatpush.bf16.msra.mxu3 %v1209_v43  ;;  %v1321_v38 = vor.u32 %v1494_v33, %v1318_v35  ;;  %v1292_v49 = vld [vmem:[#allocation5 + $0x98] sm:$0xf]  ;;  %v1487_v51 = vld [vmem:[#allocation5 + $0x9c] sm:$0xf]  ;;  %v1478_v57 = vld [vmem:[#allocation5 + $0x54] sm:$0xf] }
  0x44   : > { %v1294_v53 = vld [vmem:[#allocation5 + $0xb8] sm:$0xf0]  ;;  %v1260_v59 = vld [vmem:[#allocation5 + $0x58] sm:$0xf]  ;;  %v1614_v16 = vld [vmem:[%s1969_s4] ss:$0 sm:$0xff] }
  0x45   : > { %888 = vmatpush.bf16.msrb.mxu1 %v1281_v19  ;;  %925 = vmatpush.bf16.msra.mxu0 %v1453_v55  ;;  %v1348_v19 = vld [vmem:[#allocation5 + $0x110] sm:$0xf]  ;;  %v1297_v56 = vor.u32 %v1487_v51, %v1294_v53  ;;  %v1483_v61 = vld [vmem:[#allocation5 + $0x74] sm:$0xf0]  ;;  %v1262_v63 = vld [vmem:[#allocation5 + $0x78] sm:$0xf0] }
  0x46   : > { %897 = vmatpush.bf16.msrb.mxu2 %v1445_v50  ;;  %v1349_v22 = vor.u32 %v1506_v20, %v1348_v19  ;;  %v1491_v50 = vld [vmem:[#allocation5 + $0xb4] sm:$0xf0]  ;;  %v1482_v55 = vld [vmem:[#allocation5 + $0x6c] sm:$0xf0]  ;;  %v1261_v1 = vor.u32 %v1483_v61, %v1260_v59  ;;  %v1471_v9 = vld [vmem:[#allocation5 + $0x1c] sm:$0xf] }
  0x47   : > { %911 = vmatpush.bf16.msrb.mxu3 %v1449_v54  ;;  %v1293_v52 = vor.u32 %v1491_v50, %v1292_v49  ;;  %v1252_v54 = vld [vmem:[#allocation5 + $0x50] sm:$0xf]  ;;  %v1228_v7 = vld [vmem:[#allocation5 + $0x18] sm:$0xf]  ;;  %v1910_v25 = vld [vmem:[%s1971_s6] sm:$0xff]  ;;  %s1459_s3 = sshll.u32 %s1753_s27, 3 }
  0x48   : > { %v1253_v60 = vor.u32 %v1482_v55, %v1252_v54  ;;  %v1475_v8 = vld [vmem:[#allocation5 + $0x34] sm:$0xf0]  ;;  %v508_v29 = vperm.slane %v1910_v25, 3  ;;  %v512_v59 = vperm.slane %v1910_v25, 7  ;;  %vm1041_vm3 = vcmask 1040384   ;;  %s1068_s21 = scalar_lea.hbm %s1972_s7, %s1459_s3  ;;  %s328_s27 = scalar_lea.vmem [#allocation7], %s1923_s19 }
  0x49   : > { %889 = vmatpush.bf16.msrb.mxu1 %v1249_v32  ;;  %926 = vmatpush.bf16.msra.mxu0 %v1421_v3  ;;  %v1498_v32 = vld [vmem:[#allocation5 + $0xec] sm:$0xf0]  ;;  %vm1043_vm4 = vcmask 1042434   ;;  %vm1048_vm5 = vcmask 1046534   ;;  %vm1046_vm6 = vcmask 1044484   ;;  %vm1050_vm7 = vcmask 1045508  }
  0x4a   : > { %898 = vmatpush.bf16.msrb.mxu2 %v1413_v62  ;;  %v1479_v62 = vld [vmem:[#allocation5 + $0x5c] sm:$0xf]  ;;  %v1474_v3 = vld [vmem:[#allocation5 + $0x2c] sm:$0xf0]  ;;  %vm1052_vm8 = vcmask 1043456   ;;  %s1070_s22 = sshll.u32 %s328_s27, 4  ;;  %s1071_s22 = int_to_ptr.vmem [resolvable:$true] %s1070_s22 }
  0x4b   : > { %912 = vmatpush.bf16.msrb.mxu3 %v1417_v2  ;;  %v1220_v2 = vld [vmem:[#allocation5 + $0x10] sm:$0xf]  ;;  %s1072_s23 = sshll.u32 %s1068_s21, 4  ;;  %s1058_s16 = scalar_lea.sflag [#allocation4], %s326_s18  ;;  %s1073_s23 = int_to_ptr.hbm [resolvable:$true] %s1072_s23 }
  0x4c   : > { %v1221_v11 = vor.u32 %v1474_v3, %v1220_v2  ;;  %s1689_s30 = sshra.s32 %s1073_s23, 4  ;;  %s1695_s17 = scalar_lea.hbm %s1972_s7, 16  ;;  %s1690_s30 = int_to_ptr.hbm [resolvable:$true] %s1689_s30 }
  0x4d   : > { %890 = vmatpush.bf16.msrb.mxu1 %v1217_v45  ;;  %v1486_v45 = vld [vmem:[#allocation5 + $0x94] sm:$0xf]  ;;  %s1691_s8 = scalar_lea.hbm %s1690_s30, 8  ;;  %p1696_p5 = scmp.lt.s32.totalorder %s1690_s30, %s1972_s7 }
  0x4e   : > { %899 = vmatpush.bf16.msrb.mxu2 %v1381_v10  ;;  %v1230_v10 = vld [vmem:[#allocation5 + $0x38] sm:$0xf0]  ;;  %p1692_p1 = scmp.ne.s32.totalorder %s1690_s30, %s1691_s8  ;;  %p1697_p6 = scmp.lt.s32.totalorder %s1695_s17, %s1691_s8 }
  0x4f   : > { %913 = vmatpush.bf16.msrb.mxu3 %v1385_v14  ;;  %v1233_v14 = vor.u32 %v1471_v9, %v1230_v10 }
  0x50   : > { %p1693_p2 = pnand %p1692_p1, %p1849_p4  ;;  %p1698_p7 = por %p1697_p6, %p1696_p5 }
  0x52   : > { %900 = vmatpush.bf16.msrb.mxu2 %v1349_v22  ;;  %p1694_p3 = pneg %p1693_p2 }
  0x54   : > { %p1699_p9 = pnand %p1698_p7, %p1694_p3 }
  0xa3   : > { %v374_v5 = vpop.f32.mrf.mxu0 }
  0xa4   : > { %v375_v26 = vadd.f32 %v1613_v12, %v374_v5  ;;  %v1422_v5 = vld [vmem:[#allocation5 + $0x1b8] sm:$0xf0] }
  0xa5   : > { %v1425_v6 = vor.u32 %v1519_v4, %v1422_v5  ;;  %v1470_v4 = vld [vmem:[#allocation5 + $0x14] sm:$0xf]  ;;  %v1265_v5 = vor.u32 %v1479_v62, %v1262_v63 }
  0xa6   : > { %v379_v41 = vmax.f32 %v375_v26, 0.0  ;;  %v1353_v26 = vor.u32 %v1502_v21, %v1350_v23 }
  0xa8   : > { %914 = vmatpush.bf16.msrb.mxu3 %v1353_v26  ;;  %v507_v26 = vperm.slane %v1910_v25, 2 }
  0xab   : > { %v376_v31 = vpop.f32.mrf.mxu0 }
  0xac   : > { %v377_v36 = vadd.f32 %v1613_v12, %v376_v31  ;;  %v1388_v12 = vld [vmem:[#allocation5 + $0x158] sm:$0xf]  ;;  %v1316_v31 = vld [vmem:[#allocation5 + $0xd0] sm:$0xf]  ;;  %915 = vmatpush.bf16.msrb.mxu3 %v1321_v38 }
  0xad   : > { %v1389_v15 = vor.u32 %v1515_v13, %v1388_v12  ;;  %v1317_v34 = vor.u32 %v1498_v32, %v1316_v31  ;;  %v1229_v13 = vor.u32 %v1475_v8, %v1228_v7  ;;  %v506_v31 = vperm.slane %v1910_v25, 1 }
  0xae   : > { %v380_v42 = vmax.f32 %v377_v36, 0.0  ;;  %v1324_v36 = vld [vmem:[#allocation5 + $0xd8] sm:$0xf] }
  0xaf   : > { %927 = vmatpush.bf16.msra.mxu0 %v1389_v15  ;;  %v1325_v39 = vor.u32 %v1499_v37, %v1324_v36  ;;  %901 = vmatpush.bf16.msrb.mxu2 %v1317_v34  ;;  %v505_v37 = vperm.slane %v1910_v25, 0 }
  0xb0   : > { %v381_v46 = vpack.c.bf16 %v380_v42, %v379_v41  ;;  %v1326_v41 = vld [vmem:[#allocation5 + $0xf8] sm:$0xf0]  ;;  %v1284_v42 = vld [vmem:[#allocation5 + $0x90] sm:$0xf] }
  0xb1   : > { %v1329_v43 = vor.u32 %v1495_v40, %v1326_v41  ;;  %v1285_v47 = vor.u32 %v1490_v44, %v1284_v42 }
  0xb2   : > { %1201 = vmatmul.msk.bf16.vlgmr.msra.gmra.mxu1 %vm418_vm2, %v381_v46  ;;  %v1286_v46 = vld [vmem:[#allocation5 + $0xb0] sm:$0xf0] }
  0xb3   : > { %939 = vmatpush.bf16.msra.mxu1 %v1457_v58  ;;  %928 = vmatpush.bf16.msra.mxu0 %v1357_v27  ;;  %v1289_v48 = vor.u32 %v1486_v45, %v1286_v46  ;;  %v1254_v58 = vld [vmem:[#allocation5 + $0x70] sm:$0xf0] }
  0xb4   : > { %902 = vmatpush.bf16.msrb.mxu2 %v1285_v47  ;;  %v1257_v0 = vor.u32 %v1478_v57, %v1254_v58  ;;  %v511_v57 = vperm.slane %v1910_v25, 6 }
  0xb5   : > { %916 = vmatpush.bf16.msrb.mxu3 %v1289_v48 }
  0xb7   : > { %940 = vmatpush.bf16.msra.mxu1 %v1425_v6  ;;  %929 = vmatpush.bf16.msra.mxu0 %v1325_v39  ;;  %v1222_v6 = vld [vmem:[#allocation5 + $0x30] sm:$0xf0] }
  0xb8   : > { %903 = vmatpush.bf16.msrb.mxu2 %v1253_v60  ;;  %v1225_v12 = vor.u32 %v1470_v4, %v1222_v6  ;;  %v509_v4 = vperm.slane %v1910_v25, 4  ;;  %v510_v6 = vperm.slane %v1910_v25, 5 }
  0xb9   : > { %917 = vmatpush.bf16.msrb.mxu3 %v1257_v0 }
  0xbb   : > { %941 = vmatpush.bf16.msra.mxu1 %v1393_v18  ;;  %930 = vmatpush.bf16.msra.mxu0 %v1293_v52 }
  0xbc   : > { %904 = vmatpush.bf16.msrb.mxu2 %v1221_v11 }
  0xbd   : > { %918 = vmatpush.bf16.msrb.mxu3 %v1225_v12 }
  0xbf   : > { %942 = vmatpush.bf16.msra.mxu1 %v1361_v30  ;;  %931 = vmatpush.bf16.msra.mxu0 %v1261_v1 }
  0xc3   : > { %943 = vmatpush.bf16.msra.mxu1 %v1329_v43  ;;  %932 = vmatpush.bf16.msra.mxu0 %v1229_v13 }
  0xc7   : > { %944 = vmatpush.bf16.msra.mxu1 %v1297_v56 }
  0xcb   : > { %945 = vmatpush.bf16.msra.mxu1 %v1265_v5 }
  0xcf   : > { %946 = vmatpush.bf16.msra.mxu1 %v1233_v14 }
 0x12f   : > { %v431_v15 = vpop.f32.mrf.mxu1 }
 0x130   : > { %v432_v17 = vadd.f32 %v1614_v16, %v431_v15 }
 0x132   : > { %v436_v20 = vmax.f32 %v432_v17, 0.0 }
 0x137   : > { %v433_v18 = vpop.f32.mrf.mxu1 }
 0x138   : > { %v434_v19 = vadd.f32 %v1614_v16, %v433_v18 }
 0x13a   : > { %v437_v21 = vmax.f32 %v434_v19, 0.0 }
 0x13c   : > { %v438_v22 = vpack.c.bf16 %v437_v21, %v436_v20 }
 0x13e   : > { %849 = vmatmul.bf16.vlgmr.msra.gmra.mxu2 %v438_v22  ;;  %863 = vmatmul.bf16.vlgmr.msra.gmra.mxu3 %v438_v22 }
 0x13f   : > { %877 = vmatmul.bf16.vlgmr.msrb.gmra.mxu0 %v438_v22  ;;  %891 = vmatmul.bf16.vlgmr.msrb.gmra.mxu1 %v438_v22 }
 0x14e   : > { %905 = vmatmul.bf16.vlgmr.msrb.gmra.mxu2 %v438_v22  ;;  %919 = vmatmul.bf16.vlgmr.msrb.gmra.mxu3 %v438_v22 }
 0x14f   : > { %933 = vmatmul.bf16.vlgmr.msra.gmra.mxu0 %v438_v22  ;;  %947 = vmatmul.bf16.vlgmr.msra.gmra.mxu1 %v438_v22 }
 0x1bc   : > { %v878_v23 = vpop.f32.mrf.mxu0  ;;  %v892_v24 = vpop.f32.mrf.mxu1 }
 0x1bd   : > { %v879_v30 = vadd.f32 %v878_v23, %v507_v26  ;;  %v893_v36 = vadd.f32 %v892_v24, %v508_v29 }
 0x1bf   : > { %v955_v39 = vmax.f32 %v879_v30, 0.0  ;;  %v956_v47 = vmax.f32 %v893_v36, 0.0 }
 0x1c1   : > { %v850_v27 = vpop.f32.mrf.mxu2  ;;  %v864_v28 = vpop.f32.mrf.mxu3 }
 0x1c2   : > { %v865_v40 = vadd.f32 %v864_v28, %v506_v31  ;;  %v851_v48 = vadd.f32 %v850_v27, %v505_v37 }
 0x1c4   : > { %v880_v32 = vpop.f32.mrf.mxu0  ;;  %v894_v33 = vpop.f32.mrf.mxu1  ;;  %v954_v49 = vmax.f32 %v865_v40, 0.0  ;;  %v953_v58 = vmax.f32 %v851_v48, 0.0 }
 0x1c5   : > { %v881_v34 = vadd.f32 %v880_v32, %v507_v26  ;;  %v895_v35 = vadd.f32 %v894_v33, %v508_v29 }
 0x1c7   : > { %v963_v38 = vmax.f32 %v881_v34, 0.0  ;;  %v964_v41 = vmax.f32 %v895_v35, 0.0 }
 0x1c9   : > { %v852_v42 = vpop.f32.mrf.mxu2  ;;  %v866_v43 = vpop.f32.mrf.mxu3  ;;  %v984_v44 = vmax.f32 %v955_v39, %v963_v38  ;;  %v991_v53 = vmax.f32 %v956_v47, %v964_v41 }
 0x1ca   : > { %v853_v45 = vadd.f32 %v852_v42, %v505_v37  ;;  %v867_v46 = vadd.f32 %v866_v43, %v506_v31 }
 0x1cb   : > { %v985_v55 = vrot.slane %v984_v44, 4  ;;  %v992_v61 = vrot.slane %v991_v53, 4 }
 0x1cc   : > { %v962_v50 = vmax.f32 %v867_v46, 0.0  ;;  %v934_v51 = vpop.f32.mrf.mxu0  ;;  %v948_v52 = vpop.f32.mrf.mxu1  ;;  %v961_v54 = vmax.f32 %v853_v45, 0.0 }
 0x1cd   : > { %v986_v1 = vmax.f32 %v984_v44, %v985_v55  ;;  %v935_v2 = vadd.f32 %v934_v51, %v511_v57  ;;  %v949_v3 = vadd.f32 %v948_v52, %v512_v59  ;;  %v993_v9 = vmax.f32 %v991_v53, %v992_v61 }
 0x1ce   : > { %v977_v56 = vmax.f32 %v954_v49, %v962_v50  ;;  %v970_v62 = vmax.f32 %v953_v58, %v961_v54 }
 0x1cf   : > { %v987_v13 = vrot.slane %v986_v1, 2  ;;  %v959_v14 = vmax.f32 %v935_v2, 0.0  ;;  %v960_v15 = vmax.f32 %v949_v3, 0.0  ;;  %v994_v21 = vrot.slane %v993_v9, 2 }
 0x1d0   : > { %v978_v60 = vrot.slane %v977_v56, 4  ;;  %v971_v10 = vrot.slane %v970_v62, 4 }
 0x1d1   : > { %v906_v63 = vpop.f32.mrf.mxu2  ;;  %v920_v0 = vpop.f32.mrf.mxu3  ;;  %v988_v29 = vmax.f32 %v986_v1, %v987_v13  ;;  %v995_v37 = vmax.f32 %v993_v9, %v994_v21 }
 0x1d2   : > { %v979_v5 = vmax.f32 %v977_v56, %v978_v60  ;;  %v907_v16 = vadd.f32 %v906_v63, %v509_v4  ;;  %v921_v20 = vadd.f32 %v920_v0, %v510_v6  ;;  %v972_v22 = vmax.f32 %v970_v62, %v971_v10 }
 0x1d3   : > { %v989_v45 = vrot.slane %v988_v29, 1  ;;  %v996_v49 = vrot.slane %v995_v37, 1 }
 0x1d4   : > { %v936_v7 = vpop.f32.mrf.mxu0  ;;  %v950_v8 = vpop.f32.mrf.mxu1  ;;  %v980_v19 = vrot.slane %v979_v5, 2  ;;  %v957_v30 = vmax.f32 %v907_v16, 0.0  ;;  %v958_v34 = vmax.f32 %v921_v20, 0.0  ;;  %v973_v38 = vrot.slane %v972_v22, 2 }
 0x1d5   : > { %v937_v11 = vadd.f32 %v936_v7, %v511_v57  ;;  %v951_v12 = vadd.f32 %v950_v8, %v512_v59  ;;  %v990_v60 = vmax.f32 %v988_v29, %v989_v45  ;;  %v997_v61 = vmax.f32 %v995_v37, %v996_v49 }
 0x1d6   : > { %v981_v33 = vmax.f32 %v979_v5, %v980_v19  ;;  %v974_v50 = vmax.f32 %v972_v22, %v973_v38 }
 0x1d7   : > { %v967_v17 = vmax.f32 %v937_v11, 0.0  ;;  %v968_v18 = vmax.f32 %v951_v12, 0.0  ;;  %v1036_v7 = vrot.slane %v997_v61, 5 }
 0x1d8   : > { %v982_v46 = vrot.slane %v981_v33, 1  ;;  %v975_v62 = vrot.slane %v974_v50, 1 }
 0x1d9   : > { %v1012_v23 = vmax.f32 %v959_v14, %v967_v17  ;;  %v1019_v24 = vmax.f32 %v960_v15, %v968_v18  ;;  %v908_v26 = vpop.f32.mrf.mxu2  ;;  %v922_v25 = vpop.f32.mrf.mxu3 }
 0x1da   : > { %v909_v27 = vadd.f32 %v908_v26, %v509_v4  ;;  %v923_v28 = vadd.f32 %v922_v25, %v510_v6  ;;  %v983_v57 = vmax.f32 %v981_v33, %v982_v46  ;;  %v1035_v6 = vrot.slane %v990_v60, 6 }
 0x1db   : > { %v1013_v31 = vrot.slane %v1012_v23, 4  ;;  %v1020_v32 = vrot.slane %v1019_v24, 4  ;;  %v976_v8 = vmax.f32 %v974_v50, %v975_v62 }
 0x1dc   : > { %v965_v35 = vmax.f32 %v909_v27, 0.0  ;;  %v966_v36 = vmax.f32 %v923_v28, 0.0  ;;  %v1034_v3 = vrot.slane %v983_v57, 7  ;;  %v1044_v16 = vsel %vm1043_vm4, %v1035_v6, %v1036_v7 }
 0x1dd   : > { %v1014_v39 = vmax.f32 %v1012_v23, %v1013_v31  ;;  %v1021_v40 = vmax.f32 %v1019_v24, %v1020_v32 }
 0x1de   : > { %v998_v41 = vmax.f32 %v957_v30, %v965_v35  ;;  %v1005_v42 = vmax.f32 %v958_v34, %v966_v36  ;;  %v1042_v13 = vsel %vm1041_vm3, %v976_v8, %v1034_v3 }
 0x1df   : > { %v1015_v43 = vrot.slane %v1014_v39, 2  ;;  %v1022_v44 = vrot.slane %v1021_v40, 2  ;;  %v1045_v19 = vsel %vm361_vm0, %v1042_v13, %v1044_v16 }
 0x1e0   : > { %v999_v47 = vrot.slane %v998_v41, 4  ;;  %v1006_v48 = vrot.slane %v1005_v42, 4 }
 0x1e1   : > { %v1016_v51 = vmax.f32 %v1014_v39, %v1015_v43  ;;  %v1023_v52 = vmax.f32 %v1021_v40, %v1022_v44 }
 0x1e2   : > { %v1000_v53 = vmax.f32 %v998_v41, %v999_v47  ;;  %v1007_v54 = vmax.f32 %v1005_v42, %v1006_v48 }
 0x1e3   : > { %v1017_v55 = vrot.slane %v1016_v51, 1  ;;  %v1024_v56 = vrot.slane %v1023_v52, 1 }
 0x1e4   : > { %v1001_v58 = vrot.slane %v1000_v53, 2  ;;  %v1008_v59 = vrot.slane %v1007_v54, 2 }
 0x1e5   : > { %v1018_v63 = vmax.f32 %v1016_v51, %v1017_v55  ;;  %v1025_v0 = vmax.f32 %v1023_v52, %v1024_v56 }
 0x1e6   : > { %v1002_v1 = vmax.f32 %v1000_v53, %v1001_v58  ;;  %v1009_v2 = vmax.f32 %v1007_v54, %v1008_v59 }
 0x1e7   : > { %v1039_v9 = vrot.slane %v1018_v63, 2  ;;  %v1040_v10 = vrot.slane %v1025_v0, 1 }
 0x1e8   : > { %v1003_v4 = vrot.slane %v1002_v1, 1  ;;  %v1010_v5 = vrot.slane %v1009_v2, 1 }
 0x1e9   : > { %v1049_v17 = vsel %vm1048_vm5, %v1039_v9, %v1040_v10 }
 0x1ea   : > { %v1004_v11 = vmax.f32 %v1002_v1, %v1003_v4  ;;  %v1011_v12 = vmax.f32 %v1009_v2, %v1010_v5 }
 0x1ec   : > { %v1037_v14 = vrot.slane %v1004_v11, 4  ;;  %v1038_v15 = vrot.slane %v1011_v12, 3 }
 0x1ee   : > { %v1047_v18 = vsel %vm1046_vm6, %v1037_v14, %v1038_v15 }
 0x1ef   : > { %v1051_v20 = vsel %vm1050_vm7, %v1047_v18, %v1049_v17 }
 0x1f0   : > { %v1053_v21 = vsel %vm1052_vm8, %v1045_v19, %v1051_v20 }
 0x1f1   : > { %1056 = vst [vmem:[%s328_s27] sm:$0xff] %v1053_v21 }
 0x1f2   : > { %1702 = shalt.err (!%p1699_p9)
}
 0x1f3   : > { %1540 = dma.vmem_to_hbm [thread:$0]  (%p1849_p4), %s1071_s22, 128, %s1073_s23, %s1058_s16  }
 0x1f4 PF: > { %p1557_p10 = scmp.ge.s32.totalorder %s1761_s29, 2  ;;  %s1084_s18 = sand.u32 1, %s1741_s24  }
 0x1f5   : > { %s1085_s15 = scalar_lea.sflag [#allocation4], %s1084_s18 }
 0x1f6   : > { %p1550_p11 = pnand %p1557_p10, %p1856_p8 }
 0x1f8   : > { %p1551_p12 = pneg %p1550_p11 }
 0x1fa   : > { %1736 = dma.done.wait (%p1551_p12), %s1085_s15, 128  }
 0x1fb   : > { %1738 = vsyncadd (%p1551_p12), %s1085_s15, 4294967168  ;;  %s22_s29 = sadd.s32 1, %s1761_s29   ;;  %s1979_s24 = smov %s1745_s25 }
 0x1fc   : > { %p19_p13 = scmp.ge.s32.totalorder %s22_s29, 4   ;;  %s1980_s25 = smov %s1749_s26 }
 0x1fd   : > { %s1981_s26 = smov %s1862_s14  ;;  %s1982_s27 = smov %s1757_s28 }
 0x1fe   : > { %s1983_s28 = smov %s1985_s9  ;;  %21 = sbr.rel (!%p19_p13) target bundleno = 8 (0x8), region = 96 }
 0x203   :  { %1091 = vsyncpa [#allocation3], 1 }
 0x204   :  { %1093 = vsyncpa [#allocation3 + $0x1], 1 }
 0x205   :  { %1094 = vsyncpa [#allocation6], 1 }
 0x206   :  { %1095 = vsyncpa [#allocation4], 1 }
 0x207   :  { %1097 = vsyncpa [#allocation4 + $0x1], 1 }

</bundles_post_ra>
